<compile_context>
chip_gen: v7x
topology: tpu7x:2x2x1
jax: 0.10.0
libtpu: 0.0.40
codegen_flags: <defaults>
</compile_context>

<pallas_src>
import jax
import jax.numpy as jnp
from jax.experimental import pallas as pl
from jax.experimental.pallas import tpu as pltpu

_LANE = 128
_SUBLANE = 8


def _round_up(x, m):
    return ((x + m - 1) // m) * m


# ----------------------------- kernels --------------------------------------


def _vh1_kernel(x_ref, w_ref, b_ref, o_ref):
    # y = x @ W + b   (single Linear; W/b pre-padded to a lane-dense n_out)
    y = jnp.dot(x_ref[...], w_ref[...], preferred_element_type=jnp.float32)
    o_ref[...] = (y + b_ref[...]).astype(o_ref.dtype)


def _vh2_kernel(x_ref, w1_ref, b1_ref, w2_ref, b2_ref, o_ref):
    # y = relu(x @ W1 + b1) @ W2 + b2   (fused 2-layer MLP, all f32 on-chip)
    h = jnp.dot(x_ref[...], w1_ref[...], preferred_element_type=jnp.float32)
    h = jnp.maximum(h + b1_ref[...], 0.0)
    y = jnp.dot(h, w2_ref[...], preferred_element_type=jnp.float32)
    o_ref[...] = (y + b2_ref[...]).astype(o_ref.dtype)


# --------------------------- param preparation -------------------------------


def prepare_params(params, *, layers=1):
    """One-time layout prep: transpose PyTorch [out, in] weights to [in, out]
    and zero-pad the output (and hidden) feature dims to multiples of 128 so
    all kernel stores / intermediates are lane-dense."""
    def prep_linear(w, b):
        n_out, n_in = w.shape
        n_pad = _round_up(n_out, _LANE)
        wt = jnp.zeros((n_in, n_pad), w.dtype).at[:, :n_out].set(w.T)
        bp = jnp.zeros((1, n_pad), b.dtype).at[0, :n_out].set(b)
        return wt, bp, n_out, n_pad

    if layers == 1:
        w1, b1, n_out, n_pad = prep_linear(params["w1"], params["b1"])
        return {"w1": w1, "b1": b1, "n_out": n_out, "n_out_pad": n_pad}
    elif layers == 2:
        # Hidden dim padded too: extra columns are zero-weight/zero-bias, ReLU
        # keeps them at 0, and the matching zero rows of W2 contribute nothing.
        w1, b1, hidden, h_pad = prep_linear(params["w1"], params["b1"])
        w2_raw, b2_raw = params["w2"], params["b2"]
        n_out = w2_raw.shape[0]
        n_pad = _round_up(n_out, _LANE)
        w2 = jnp.zeros((h_pad, n_pad), w2_raw.dtype).at[:hidden, :n_out].set(w2_raw.T)
        b2 = jnp.zeros((1, n_pad), b2_raw.dtype).at[0, :n_out].set(b2_raw)
        return {"w1": w1, "b1": b1, "w2": w2, "b2": b2,
                "n_out": n_out, "n_out_pad": n_pad, "hidden_pad": h_pad}
    else:
        raise NotImplementedError(
            "Only 1 or 2 layers are supported for the value head.")


# ------------------------------ tiling helpers --------------------------------


def _choose_tile_rows(n_in, n_out_pad, hidden_pad=0,
                      *, vmem_budget_bytes=8 << 20, max_tb=1024):
    """Batch tile from a VMEM budget: f32, double-buffered x tile +
    double-buffered output slab + hidden intermediate."""
    bytes_per_row = 4 * (2 * n_in + 2 * n_out_pad + hidden_pad)
    tb = vmem_budget_bytes // max(bytes_per_row, 1)
    tb = max(_SUBLANE, min(int(tb), max_tb))
    return (tb // _SUBLANE) * _SUBLANE


def _vmem_limit(tb, n_in, n_out_pad, hidden_pad, weight_bytes):
    est = 4 * tb * (2 * n_in + 2 * n_out_pad + hidden_pad) + 2 * weight_bytes
    # 4x headroom, floored at 16 MiB, capped well under v7x's 64 MiB physical.
    return int(min(48 << 20, max(4 * est, 16 << 20)))


# ------------------------------ forward wrapper --------------------------------


def value_head_forward(x, prepared, *, layers=1, detach_head=False,
                       vmem_budget_bytes=8 << 20, max_block_rows=1024):
    """Pallas implementation of ValueHead.forward.

    x:        [B, n_in] float32
    prepared: output of prepare_params (pre-transposed / lane-padded weights).
    """
    if detach_head:
        x = jax.lax.stop_gradient(x)  # autograd-only; forward values identical

    B, n_in = x.shape
    n_out = prepared["n_out"]
    n_out_pad = prepared["n_out_pad"]
    hidden_pad = prepared.get("hidden_pad", 0)

    tb = _choose_tile_rows(n_in, n_out_pad, hidden_pad,
                           vmem_budget_bytes=vmem_budget_bytes,
                           max_tb=max_block_rows)

    if B <= tb:
        # Whole batch in one block. Pad at most 7 rows to stay sublane-aligned.
        tb = _round_up(B, _SUBLANE)
        if tb != B:
            x = jnp.pad(x, ((0, tb - B), (0, 0)))
        rows = tb
        grid = (1,)
    else:
        # Multi-block: let Pallas mask the boundary block (no HBM copy of x).
        rows = B
        grid = (pl.cdiv(B, tb),)

    if layers == 1:
        w1, b1 = prepared["w1"], prepared["b1"]
        weight_bytes = (w1.size + b1.size) * 4
        out = pl.pallas_call(
            _vh1_kernel,
            out_shape=jax.ShapeDtypeStruct((rows, n_out_pad), x.dtype),
            grid_spec=pltpu.PrefetchScalarGridSpec(
                num_scalar_prefetch=0,
                grid=grid,
                in_specs=[
                    pl.BlockSpec((tb, n_in), lambda i: (i, 0)),
                    pl.BlockSpec((n_in, n_out_pad), lambda i: (0, 0)),
                    pl.BlockSpec((1, n_out_pad), lambda i: (0, 0)),
                ],
                out_specs=pl.BlockSpec((tb, n_out_pad), lambda i: (i, 0)),
            ),
            compiler_params=pltpu.CompilerParams(
                dimension_semantics=("parallel",),
                vmem_limit_bytes=_vmem_limit(tb, n_in, n_out_pad, 0,
                                             weight_bytes)),
        )(x, w1, b1)

    elif layers == 2:
        w1, b1 = prepared["w1"], prepared["b1"]
        w2, b2 = prepared["w2"], prepared["b2"]
        weight_bytes = (w1.size + b1.size + w2.size + b2.size) * 4
        out = pl.pallas_call(
            _vh2_kernel,
            out_shape=jax.ShapeDtypeStruct((rows, n_out_pad), x.dtype),
            grid_spec=pltpu.PrefetchScalarGridSpec(
                num_scalar_prefetch=0,
                grid=grid,
                in_specs=[
                    pl.BlockSpec((tb, n_in), lambda i: (i, 0)),
                    pl.BlockSpec((n_in, hidden_pad), lambda i: (0, 0)),
                    pl.BlockSpec((1, hidden_pad), lambda i: (0, 0)),
                    pl.BlockSpec((hidden_pad, n_out_pad), lambda i: (0, 0)),
                    pl.BlockSpec((1, n_out_pad), lambda i: (0, 0)),
                ],
                out_specs=pl.BlockSpec((tb, n_out_pad), lambda i: (i, 0)),
            ),
            compiler_params=pltpu.CompilerParams(
                dimension_semantics=("parallel",),
                vmem_limit_bytes=_vmem_limit(tb, n_in, n_out_pad, hidden_pad,
                                             weight_bytes)),
        )(x, w1, b1, w2, b2)

    else:
        raise NotImplementedError(
            "Only 1 or 2 layers are supported for the value head.")

    # Slice off any batch padding and the lane padding of n_out.
    return out[:B, :n_out]


# ----------------------------- reference & init -------------------------------


def value_head_reference(x, params, *, layers=1):
    if layers == 1:
        return x @ params["w1"].T + params["b1"]
    h = jnp.maximum(x @ params["w1"].T + params["b1"], 0.0)
    return h @ params["w2"].T + params["b2"]


def init_params(key, n_in, n_out, layers, hidden_scale=2):
    """Deterministic init mimicking nn.Linear's uniform(-1/sqrt(fan_in), ...)."""
    def linear_init(k, fan_in, fan_out):
        kw, kb = jax.random.split(k)
        bound = 1.0 / jnp.sqrt(fan_in)
        w = jax.random.uniform(kw, (fan_out, fan_in), jnp.float32, -bound, bound)
        b = jax.random.uniform(kb, (fan_out,), jnp.float32, -bound, bound)
        return w, b

    if layers == 1:
        w1, b1 = linear_init(key, n_in, n_out)
        return {"w1": w1, "b1": b1}
    hidden = int(n_in * hidden_scale)
    k1, k2 = jax.random.split(key)
    w1, b1 = linear_init(k1, n_in, hidden)
    w2, b2 = linear_init(k2, hidden, n_out)
    return {"w1": w1, "b1": b1, "w2": w2, "b2": b2}


if __name__ == "__main__":
    key = jax.random.PRNGKey(0)
    kx, kp1, kp2, kx2, kx3 = jax.random.split(key, 5)

    # Module defaults: n_in=64, n_out=1
    B, n_in, n_out = 8, 64, 1
    x = jax.random.normal(kx, (B, n_in), jnp.float32)

    # layers == 1 (module default)
    params1 = init_params(kp1, n_in, n_out, layers=1)
    prep1 = prepare_params(params1, layers=1)            # one-time layout prep
    y1 = jax.block_until_ready(
        value_head_forward(x, prep1, layers=1, detach_head=False))
    ref1 = value_head_reference(x, params1, layers=1)
    assert y1.shape == (B, n_out)
    assert jnp.allclose(y1, ref1, atol=1e-5, rtol=1e-5)

    # layers == 2 (hidden = n_in * hidden_scale = 128), detach_head=True
    params2 = init_params(kp2, n_in, n_out, layers=2, hidden_scale=2)
    prep2 = prepare_params(params2, layers=2)
    y2 = jax.block_until_ready(
        value_head_forward(x, prep2, layers=2, detach_head=True))
    ref2 = value_head_reference(x, params2, layers=2)
    assert y2.shape == (B, n_out)
    assert jnp.allclose(y2, ref2, atol=1e-5, rtol=1e-5)

    # Non-8-aligned batch that still fits one block: minimal (<=7 row) pad path.
    B2 = 300
    x2 = jax.random.normal(kx2, (B2, n_in), jnp.float32)
    y3 = jax.block_until_ready(value_head_forward(x2, prep2, layers=2))
    ref3 = value_head_reference(x2, params2, layers=2)
    assert y3.shape == (B2, n_out)
    assert jnp.allclose(y3, ref3, atol=1e-5, rtol=1e-5)

    # Multi-block, non-divisible grid: exercises the masked boundary block
    # (no jnp.pad copy of x).
    B3 = 600
    x3 = jax.random.normal(kx3, (B3, n_in), jnp.float32)
    y4 = jax.block_until_ready(
        value_head_forward(x3, prep1, layers=1, max_block_rows=256))
    ref4 = value_head_reference(x3, params1, layers=1)
    assert y4.shape == (B3, n_out)
    assert jnp.allclose(y4, ref4, atol=1e-5, rtol=1e-5)

    print("KERNEL_OK")
</pallas_src>

<mosaic_0001>
module attributes {stable_mosaic.version = 11 : i64} {
  func.func @_vh1_kernel(%arg0: i32, %arg1: memref<8x64xf32, #tpu.memory_space<vmem>>, %arg2: memref<64x128xf32, #tpu.memory_space<vmem>>, %arg3: memref<1x128xf32, #tpu.memory_space<vmem>>, %arg4: memref<8x128xf32, #tpu.memory_space<vmem>>) attributes {dimension_semantics = [#tpu.dimension_semantics<parallel>], iteration_bounds = array<i64: 1>, scalar_prefetch = 0 : i64, scratch_operands = 0 : i64, tpu.core_type = #tpu.core_type<tc>, window_params = [{transform_indices = @transform_0, window_bounds = array<i64: 8, 64>}, {pipeline_mode = #tpu.pipeline_mode<synchronous>, transform_indices = @transform_1, window_bounds = array<i64: 64, 128>}, {pipeline_mode = #tpu.pipeline_mode<synchronous>, transform_indices = @transform_2, window_bounds = array<i64: 1, 128>}, {transform_indices = @transform_3, window_bounds = array<i64: 8, 128>}]} {
    %c0 = arith.constant 0 : index
    %c0_0 = arith.constant 0 : index
    %0 = vector.load %arg1[%c0, %c0_0] : memref<8x64xf32, #tpu.memory_space<vmem>>, vector<8x64xf32>
    %c0_1 = arith.constant 0 : index
    %c0_2 = arith.constant 0 : index
    %1 = vector.load %arg2[%c0_1, %c0_2] : memref<64x128xf32, #tpu.memory_space<vmem>>, vector<64x128xf32>
    %cst = arith.constant dense<0.000000e+00> : vector<8x128xf32>
    %2 = tpu.matmul %0, %1, %cst {dimension_numbers = #tpu.dot_dimension_numbers<[1], [0], [0], [1], [0, 0, 1, 1], [], []>} : vector<8x64xf32>, vector<64x128xf32>, vector<8x128xf32> -> vector<8x128xf32>
    %c0_3 = arith.constant 0 : index
    %c0_4 = arith.constant 0 : index
    %3 = vector.load %arg3[%c0_3, %c0_4] : memref<1x128xf32, #tpu.memory_space<vmem>>, vector<1x128xf32>
    %4 = vector.broadcast %3 : vector<1x128xf32> to vector<8x128xf32>
    %5 = arith.addf %2, %4 : vector<8x128xf32>
    %c0_5 = arith.constant 0 : index
    %c0_6 = arith.constant 0 : index
    %6 = vector.load %arg4[%c0_5, %c0_6] : memref<8x128xf32, #tpu.memory_space<vmem>>, vector<8x128xf32>
    tpu.vector_store %arg4[%c0_5, %c0_6], %5 {strides = array<i32>} : memref<8x128xf32, #tpu.memory_space<vmem>>, vector<8x128xf32>,
    return
  }
  func.func @transform_0(%arg0: i32) -> (i32, i32) {
    %c0_i32 = arith.constant 0 : i32
    %c0_i32_0 = arith.constant 0 : i32
    return %arg0, %c0_i32 : i32, i32
  }
  func.func @transform_1(%arg0: i32) -> (i32, i32) {
    %c0_i32 = arith.constant 0 : i32
    %c0_i32_0 = arith.constant 0 : i32
    %c0_i32_1 = arith.constant 0 : i32
    return %c0_i32, %c0_i32_0 : i32, i32
  }
  func.func @transform_2(%arg0: i32) -> (i32, i32) {
    %c0_i32 = arith.constant 0 : i32
    %c0_i32_0 = arith.constant 0 : i32
    %c0_i32_1 = arith.constant 0 : i32
    return %c0_i32, %c0_i32_0 : i32, i32
  }
  func.func @transform_3(%arg0: i32) -> (i32, i32) {
    %c0_i32 = arith.constant 0 : i32
    %c0_i32_0 = arith.constant 0 : i32
    return %arg0, %c0_i32 : i32, i32
  }
}

</mosaic_0001>

<bundles_post_ra>
// kernel: tpu_custom_call.1
= control target key start
LH: loop header
LB: loop body
LE: loop exit
PB: predicated region body
PF: predicated region fallthrough
CT: control target
= control target key end

     0   :  { %8 = vsyncpa [#allocation3], 0  ;;  %s344_s0 = inlined_call_operand.hbm [shape: f32[8,64], index: 0, kind: input, shape index: {}]   ;;  %s345_s1 = inlined_call_operand.hbm [shape: f32[64,128], index: 1, kind: input, shape index: {}]   ;;  %s346_s2 = inlined_call_operand.vmem [shape: f32[1,128], index: 2, kind: input, shape index: {}]   ;;  %s347_s3 = inlined_call_operand.hbm [shape: f32[8,128], index: 3, kind: output, shape index: {}]  }
   0x1   :  { %9 = vsyncpa [#allocation6], 0 }
   0x2   :  { %10 = vsyncpa [#allocation4], 0  ;;  %s270_s12 = smov [#allocation2]   ;;  %s271_s14 = smov [#allocation5]  }
   0x3   :  { %s17_s13 = sshll.u32 %s270_s12, 4  ;;  %s26_s15 = sshll.u32 %s271_s14, 4  ;;  %s18_s13 = int_to_ptr.vmem [resolvable:$true] %s17_s13  ;;  %s298_s15 = int_to_ptr.vmem [resolvable:$true] %s26_s15 }
   0x4   :  { %s198_s18 = scalar_lea.hbm %s344_s0, 128 }
   0x5   :  { %p199_p0 = scmp.ne.s32.totalorder %s344_s0, %s198_s18  ;;  %p202_p1 = scmp.lt.u32.totalorder %s198_s18, %s344_s0 }
   0x7   :  { %p204_p2 = pnand %p202_p1, %p199_p0 }
   0x9   :  { %207 = shalt.err (!%p204_p2)
}
   0xa   :  { %s208_s23 = scalar_lea.vmem %s18_s13, 128  ;;  %p213_p4 = scmp.lt.s32.totalorder %s18_s13, %s18_s13 }
   0xb   :  { %p209_p3 = scmp.ne.s32.totalorder %s18_s13, %s208_s23  ;;  %p214_p5 = scmp.lt.s32.totalorder %s208_s23, %s208_s23 }
   0xd   :  { %p215_p6 = por %p214_p5, %p213_p4 }
   0xf   :  { %p216_p7 = pnand %p215_p6, %p209_p3 }
  0x11   :  { %219 = shalt.err (!%p216_p7)
}
  0x12   :  { %20 = dma.hbm_to_vmem [thread:$0]  %s344_s0, 128, %s18_s13, [#allocation3]  }
  0x13   :  { %s220_s28 = scalar_lea.hbm %s345_s1, 1024 }
  0x14   :  { %p221_p8 = scmp.ne.s32.totalorder %s345_s1, %s220_s28  ;;  %p224_p9 = scmp.lt.u32.totalorder %s220_s28, %s345_s1 }
  0x16   :  { %p226_p10 = pnand %p224_p9, %p221_p8 }
  0x18   :  { %229 = shalt.err (!%p226_p10)
}
  0x19   :  { %s230_s6 = scalar_lea.vmem %s298_s15, 1024  ;;  %p235_p12 = scmp.lt.s32.totalorder %s298_s15, %s298_s15 }
  0x1a   :  { %p231_p11 = scmp.ne.s32.totalorder %s298_s15, %s230_s6  ;;  %p236_p13 = scmp.lt.s32.totalorder %s230_s6, %s230_s6 }
  0x1c   :  { %p237_p0 = por %p236_p13, %p235_p12 }
  0x1e   :  { %p238_p1 = pnand %p237_p0, %p231_p11 }
  0x20   :  { %241 = shalt.err (!%p238_p1)
}
  0x21   :  { %s272_s0 = smov 128   ;;  %s273_s7 = smov 8  }
  0x22   :  { %32 = dma.hbm_to_vmem [thread:$0]  %s345_s1, 1024, %s298_s15, [#allocation6], %s272_s0, %s272_s0, %s273_s7  }
  0x23   :  { %264 = dma.done.wait [#allocation3], 128  }
  0x24   :  { %265 = vsyncadd [#allocation3], 4294967168 }
  0x25   :  { %266 = dma.done.wait [#allocation6], 1024  }
  0x26   :  { %267 = vsyncadd [#allocation6], 4294966272  ;;  %v274_v0 = vmov 0.0|0.0   ;;  %vm275_vm0 = vmmov 0   ;;  %v276_v1 = vmov 0.0   ;;  %v42_v2 = vld [vmem:[#allocation5] sm:$0xff] }
  0x27   :  { %178 = vmatprep.subr.bf16.mxu0 %v274_v0  ;;  %175 = vmatprep.mubr.msk.f32.mxu0 %vm275_vm0, %v276_v1  ;;  %v43_v3 = vld [vmem:[#allocation5 + $0x8] sm:$0xff]  ;;  %v44_v4 = vld [vmem:[#allocation5 + $0x10] sm:$0xff]  ;;  %v45_v6 = vld [vmem:[#allocation5 + $0x18] sm:$0xff]  ;;  %vm57_vm1 = vcmask 523264   ;;  %s277_s11 = smov [#allocation7]  }
  0x28   :  { %v179_v5 = vpack.c.bf16 %v43_v3, %v42_v2  ;;  %v182_v7 = vpack.c.bf16 %v45_v6, %v44_v4  ;;  %v46_v8 = vld [vmem:[#allocation5 + $0x20] sm:$0xff]  ;;  %v47_v9 = vld [vmem:[#allocation5 + $0x28] sm:$0xff]  ;;  %v48_v11 = vld [vmem:[#allocation5 + $0x30] sm:$0xff]  ;;  %s138_s12 = sshll.u32 %s277_s11, 4  ;;  %s139_s12 = int_to_ptr.vmem [resolvable:$true] %s138_s12 }
  0x29   :  { %v185_v10 = vpack.c.bf16 %v47_v9, %v46_v8  ;;  %v49_v12 = vld [vmem:[#allocation5 + $0x38] sm:$0xff]  ;;  %s242_s13 = scalar_lea.vmem %s139_s12, 128  ;;  %p247_p3 = scmp.lt.s32.totalorder %s139_s12, %s139_s12 }
  0x2a   :  { %180 = vmatpush3.bf16.msra.mxu0 %v179_v5  ;;  %v188_v13 = vpack.c.bf16 %v49_v12, %v48_v11  ;;  %v41_v14 = vld [vmem:[#allocation2] sm:$0xff]  ;;  %p243_p2 = scmp.ne.s32.totalorder %s139_s12, %s242_s13  ;;  %p248_p4 = scmp.lt.s32.totalorder %s242_s13, %s242_s13 }
  0x2b   :  { %181 = vmatprep.subr.bf16.mxu0 %v274_v0  ;;  %v148_v15 = vld [vmem:[%s346_s2] ss:$0 sm:$0xff] }
  0x2c   :  { %p249_p5 = por %p248_p4, %p247_p3 }
  0x2e   :  { %183 = vmatpush3.bf16.msra.mxu0 %v182_v7  ;;  %p250_p6 = pnand %p249_p5, %p243_p2 }
  0x2f   :  { %184 = vmatprep.subr.bf16.mxu0 %v274_v0 }
  0x32   :  { %186 = vmatpush3.bf16.msra.mxu0 %v185_v10 }
  0x33   :  { %187 = vmatprep.subr.bf16.mxu0 %v274_v0 }
  0x36   :  { %189 = vmatpush3.bf16.msra.mxu0 %v188_v13 }
  0x39   :  { %176 = vmatmul.mubr.msk.f32.vlgmr.msra.gmra.mrb[0].mxu0 %vm57_vm1, %v41_v14 }
 0x10c   :  { %v127_v16 = vpop.f32.mrb[0].mxu0 }
 0x10d   :  { %v128_v17 = vadd.f32 %v148_v15, %v127_v16  ;;  %v177_v18 = vpop.f32.mrb[1].mxu0 }
 0x10f   :  { %131 = vst [vmem:[#allocation7] sm:$0xff] %v128_v17 }
 0x110   :  { %253 = shalt.err (!%p250_p6)
}
 0x111   :  { %s254_s16 = scalar_lea.hbm %s347_s3, 128 }
 0x112   :  { %p255_p7 = scmp.ne.s32.totalorder %s347_s3, %s254_s16  ;;  %p258_p8 = scmp.lt.u32.totalorder %s254_s16, %s347_s3 }
 0x114   :  { %p260_p9 = pnand %p258_p8, %p255_p7 }
 0x116   :  { %263 = shalt.err (!%p260_p9)
}
 0x117   :  { %141 = dma.vmem_to_hbm [thread:$0]  %s139_s12, 128, %s347_s3, [#allocation4]  }
 0x118   :  { %268 = dma.done.wait [#allocation4], 128  }
 0x119   :  { %269 = vsyncadd [#allocation4], 4294967168 }
 0x11a   :  { %145 = vsyncpa [#allocation3], 1 }
 0x11b   :  { %146 = vsyncpa [#allocation6], 1 }
 0x11c   :  { %147 = vsyncpa [#allocation4], 1 }

</bundles_post_ra>
